<compile_context>
chip_gen: v6e
topology: v6e:2x2x1
jax: 0.10.0
libtpu: 0.0.40
codegen_flags: <defaults>
</compile_context>

<pallas_src>
import functools

import jax
import jax.numpy as jnp
from jax import lax
from jax.experimental import pallas as pl
from jax.experimental.pallas import tpu as pltpu


def _basic_block_kernel(x_ref, m_ref, w1_ref, b1_ref, w2_ref, b2_ref, o_ref,
                        *, hgt, wid):
    """Fused BasicBlock: conv3x3+BN+ReLU -> conv3x3+BN -> (+x) -> ReLU.

    Layout: activations are (C, H*W) with H*W on the lane dimension.
    A 3x3 "same" conv is one matmul W_mat(Cout, 9*Cin) @ patches(9*Cin, H*W);
    the patch matrix is built from 9 XLU lane rotations and one full-slab
    boundary-mask multiply (equivalent to zero padding=1, done in-kernel).
    """
    nb = x_ref.shape[0]
    hw = hgt * wid

    # Loop-invariant reads hoisted out of the per-sample loop.
    mask = m_ref[...]          # (9*C, hw) 0/1 f32, precomputed on host
    w1 = w1_ref[...]           # (Cout, 9*Cin), BN1 scale already folded in
    b1 = b1_ref[...]           # (Cout, 1)
    w2 = w2_ref[...]           # (Cout, 9*Cout), BN2 scale already folded in
    b2 = b2_ref[...]           # (Cout, 1)

    # Tap order (dy, dx) matches the (kh, kw, cin) column order of w1/w2.
    offs = tuple(dy * wid + dx for dy in (-1, 0, 1) for dx in (-1, 0, 1))

    def im2col(v):
        # v: (C, hw) -> (9*C, hw). One lane rotate per tap (XLU slot, cheap);
        # wrapped lanes are exactly the out-of-bounds taps and are zeroed by
        # the single full-slab mask multiply below.
        pieces = [v if (off % hw) == 0 else pltpu.roll(v, (-off) % hw, 1)
                  for off in offs]
        return jnp.concatenate(pieces, axis=0) * mask

    for n in range(nb):        # nb == batch_tile (default 1; grid covers N)
        xb = x_ref[n]                                      # (Cin, hw) f32
        # conv1 (+ folded BN1 scale) + bias + ReLU — single K=9*Cin matmul.
        a1 = jnp.dot(w1, im2col(xb), preferred_element_type=jnp.float32)
        h1 = jnp.maximum(a1 + b1, 0.0)
        # conv2 (+ folded BN2 scale) + bias + identity shortcut + ReLU.
        # The intermediate h1 never leaves vregs/VMEM.
        a2 = jnp.dot(w2, im2col(h1), preferred_element_type=jnp.float32)
        o_ref[n] = jnp.maximum(a2 + b2 + xb, 0.0).astype(o_ref.dtype)


def _make_tap_mask(c, hgt, wid):
    """(9*c, H*W) 0/1 mask: validity of tap (dy, dx) at each output position."""
    hw = hgt * wid
    col = jnp.arange(hw, dtype=jnp.int32)
    hh = col // wid
    ww = col - hh * wid
    rows = []
    for dy in (-1, 0, 1):
        for dx in (-1, 0, 1):
            ok = ((hh + dy >= 0) & (hh + dy <= hgt - 1) &
                  (ww + dx >= 0) & (ww + dx <= wid - 1))
            rows.append(jnp.broadcast_to(ok.astype(jnp.float32)[None, :],
                                         (c, hw)))
    return jnp.concatenate(rows, axis=0)


def basic_block_forward(x_nchw, params, *, batch_tile=None):
    """BasicBlock forward (stride=1, identity shortcut). Input/output NCHW."""
    N, C, H, W = x_nchw.shape
    Cout = params["w1"].shape[0]
    assert Cout == C, "identity shortcut requires in_planes == planes"
    if batch_tile is None:
        # >= 2 grid steps so v7x's second TensorCore gets work; harmless on
        # single-TC v5e/v6e (per-step overhead ~0.35 us).
        batch_tile = 1 if N > 1 else N
    assert N % batch_tile == 0
    HW = H * W

    x_flat = x_nchw.reshape(N, C, HW)        # contiguous -> free reshape
    mask = _make_tap_mask(C, H, W)           # precomputed once, reused per step
    kernel = functools.partial(_basic_block_kernel, hgt=H, wid=W)

    out_flat = pl.pallas_call(
        kernel,
        out_shape=jax.ShapeDtypeStruct((N, Cout, HW), jnp.float32),
        grid=(N // batch_tile,),
        in_specs=[
            pl.BlockSpec((batch_tile, C, HW), lambda b: (b, 0, 0)),
            pl.BlockSpec(mask.shape, lambda b: (0, 0)),
            pl.BlockSpec(params["w1"].shape, lambda b: (0, 0)),
            pl.BlockSpec((Cout, 1), lambda b: (0, 0)),
            pl.BlockSpec(params["w2"].shape, lambda b: (0, 0)),
            pl.BlockSpec((Cout, 1), lambda b: (0, 0)),
        ],
        out_specs=pl.BlockSpec((batch_tile, Cout, HW), lambda b: (b, 0, 0)),
        compiler_params=pltpu.CompilerParams(
            dimension_semantics=("parallel",)),
    )(x_flat, mask, params["w1"], params["bias1"],
      params["w2"], params["bias2"])

    return out_flat.reshape(N, Cout, H, W)


def make_params(key, in_planes, planes, eps=1e-5):
    """Deterministic synthetic parameters; BatchNorm folded (eval mode)."""
    ks = jax.random.split(key, 10)

    def bn_fused(kg, kb, km, kv, c):
        gamma = 0.5 + jax.random.uniform(kg, (c,), jnp.float32)
        beta = 0.1 * jax.random.normal(kb, (c,), jnp.float32)
        mean = 0.1 * jax.random.normal(km, (c,), jnp.float32)
        var = 0.5 + jax.random.uniform(kv, (c,), jnp.float32)
        scale = gamma / jnp.sqrt(var + eps)
        bias = beta - mean * scale
        return scale, bias

    # PyTorch conv weights are OIHW; the kernel uses a (Cout, 9*Cin) matrix
    # whose column order matches the kernel's (dy, dx, cin) im2col row order.
    w1_oihw = 0.1 * jax.random.normal(ks[0], (planes, in_planes, 3, 3),
                                      jnp.float32)
    w2_oihw = 0.1 * jax.random.normal(ks[1], (planes, planes, 3, 3),
                                      jnp.float32)
    s1, b1 = bn_fused(ks[2], ks[3], ks[4], ks[5], planes)
    s2, b2 = bn_fused(ks[6], ks[7], ks[8], ks[9], planes)

    def to_mat(w_oihw, scale):
        # One-time parameter transform: fold the BN scale into the weights so
        # the kernel epilogue is just bias + (residual) + ReLU.
        o, i, kh, kw = w_oihw.shape
        mat = jnp.transpose(w_oihw, (0, 2, 3, 1)).reshape(o, kh * kw * i)
        return mat * scale[:, None]

    params = {
        "w1": to_mat(w1_oihw, s1), "bias1": b1.reshape(-1, 1),
        "w2": to_mat(w2_oihw, s2), "bias2": b2.reshape(-1, 1),
    }
    ref = {"w1_oihw": w1_oihw, "w2_oihw": w2_oihw,
           "scale1": s1, "bias1": b1, "scale2": s2, "bias2": b2}
    return params, ref


def reference_forward(x_nchw, ref):
    """Pure-JAX (lax.conv) reference of the same forward pass."""
    def conv(x, w):
        return lax.conv_general_dilated(
            x, w, window_strides=(1, 1), padding=((1, 1), (1, 1)),
            dimension_numbers=("NCHW", "OIHW", "NCHW"))

    def affine(x, s, b):
        return x * s[None, :, None, None] + b[None, :, None, None]

    o = jnp.maximum(affine(conv(x_nchw, ref["w1_oihw"]),
                           ref["scale1"], ref["bias1"]), 0.0)
    o = affine(conv(o, ref["w2_oihw"]), ref["scale2"], ref["bias2"])
    o = o + x_nchw
    return jnp.maximum(o, 0.0)


if __name__ == "__main__":
    N, C, H, W = 2, 4, 16, 16          # in_planes = planes = 4, stride = 1
    key = jax.random.PRNGKey(0)
    kx, kp = jax.random.split(key)
    x = jax.random.normal(kx, (N, C, H, W), jnp.float32)   # NCHW like PyTorch
    params, ref_params = make_params(kp, in_planes=C, planes=C)

    out = basic_block_forward(x, params)
    out = jax.block_until_ready(out)

    expected = reference_forward(x, ref_params)
    assert out.shape == (N, C, H, W)
    max_err = float(jnp.max(jnp.abs(out - expected)))
    assert jnp.allclose(out, expected, atol=1e-4, rtol=1e-4), max_err

    print("KERNEL_OK")
</pallas_src>

<mosaic_0001>
module attributes {stable_mosaic.version = 11 : i64} {
  func.func @_basic_block_kernel(%arg0: i32, %arg1: memref<1x4x256xf32, #tpu.memory_space<vmem>>, %arg2: memref<36x256xf32, #tpu.memory_space<vmem>>, %arg3: memref<4x36xf32, #tpu.memory_space<vmem>>, %arg4: memref<4x1xf32, #tpu.memory_space<vmem>>, %arg5: memref<4x36xf32, #tpu.memory_space<vmem>>, %arg6: memref<4x1xf32, #tpu.memory_space<vmem>>, %arg7: memref<1x4x256xf32, #tpu.memory_space<vmem>>) attributes {dimension_semantics = [#tpu.dimension_semantics<parallel>], iteration_bounds = array<i64: 2>, scalar_prefetch = 0 : i64, scratch_operands = 0 : i64, tpu.core_type = #tpu.core_type<tc>, window_params = [{transform_indices = @transform_0, window_bounds = array<i64: 1, 4, 256>}, {pipeline_mode = #tpu.pipeline_mode<synchronous>, transform_indices = @transform_1, window_bounds = array<i64: 36, 256>}, {pipeline_mode = #tpu.pipeline_mode<synchronous>, transform_indices = @transform_2, window_bounds = array<i64: 4, 36>}, {pipeline_mode = #tpu.pipeline_mode<synchronous>, transform_indices = @transform_3, window_bounds = array<i64: 4, 1>}, {pipeline_mode = #tpu.pipeline_mode<synchronous>, transform_indices = @transform_4, window_bounds = array<i64: 4, 36>}, {pipeline_mode = #tpu.pipeline_mode<synchronous>, transform_indices = @transform_5, window_bounds = array<i64: 4, 1>}, {transform_indices = @transform_6, window_bounds = array<i64: 1, 4, 256>}]} {
    %c0 = arith.constant 0 : index
    %c0_0 = arith.constant 0 : index
    %0 = vector.load %arg2[%c0, %c0_0] : memref<36x256xf32, #tpu.memory_space<vmem>>, vector<36x256xf32>
    %c0_1 = arith.constant 0 : index
    %c0_2 = arith.constant 0 : index
    %1 = vector.load %arg3[%c0_1, %c0_2] : memref<4x36xf32, #tpu.memory_space<vmem>>, vector<4x36xf32>
    %c0_3 = arith.constant 0 : index
    %c0_4 = arith.constant 0 : index
    %2 = vector.load %arg4[%c0_3, %c0_4] : memref<4x1xf32, #tpu.memory_space<vmem>>, vector<4x1xf32>
    %c0_5 = arith.constant 0 : index
    %c0_6 = arith.constant 0 : index
    %3 = vector.load %arg5[%c0_5, %c0_6] : memref<4x36xf32, #tpu.memory_space<vmem>>, vector<4x36xf32>
    %c0_7 = arith.constant 0 : index
    %c0_8 = arith.constant 0 : index
    %4 = vector.load %arg6[%c0_7, %c0_8] : memref<4x1xf32, #tpu.memory_space<vmem>>, vector<4x1xf32>
    %c0_9 = arith.constant 0 : index
    %c0_10 = arith.constant 0 : index
    %c0_11 = arith.constant 0 : index
    %5 = vector.load %arg1[%c0_9, %c0_10, %c0_11] : memref<1x4x256xf32, #tpu.memory_space<vmem>>, vector<1x4x256xf32>
    %6 = vector.shape_cast %5 : vector<1x4x256xf32> to vector<4x256xf32>
    %c17_i32 = arith.constant 17 : i32
    %7 = tpu.dynamic_rotate %6 by %c17_i32 dim 1 : vector<4x256xf32>, i32 -> vector<4x256xf32>
    %c16_i32 = arith.constant 16 : i32
    %8 = tpu.dynamic_rotate %6 by %c16_i32 dim 1 : vector<4x256xf32>, i32 -> vector<4x256xf32>
    %c15_i32 = arith.constant 15 : i32
    %9 = tpu.dynamic_rotate %6 by %c15_i32 dim 1 : vector<4x256xf32>, i32 -> vector<4x256xf32>
    %c1_i32 = arith.constant 1 : i32
    %10 = tpu.dynamic_rotate %6 by %c1_i32 dim 1 : vector<4x256xf32>, i32 -> vector<4x256xf32>
    %c255_i32 = arith.constant 255 : i32
    %11 = tpu.dynamic_rotate %6 by %c255_i32 dim 1 : vector<4x256xf32>, i32 -> vector<4x256xf32>
    %c241_i32 = arith.constant 241 : i32
    %12 = tpu.dynamic_rotate %6 by %c241_i32 dim 1 : vector<4x256xf32>, i32 -> vector<4x256xf32>
    %c240_i32 = arith.constant 240 : i32
    %13 = tpu.dynamic_rotate %6 by %c240_i32 dim 1 : vector<4x256xf32>, i32 -> vector<4x256xf32>
    %c239_i32 = arith.constant 239 : i32
    %14 = tpu.dynamic_rotate %6 by %c239_i32 dim 1 : vector<4x256xf32>, i32 -> vector<4x256xf32>
    %15 = tpu.concatenate %7, %8, %9, %10, %6, %11, %12, %13, %14 in 0 : vector<4x256xf32>, vector<4x256xf32>, vector<4x256xf32>, vector<4x256xf32>, vector<4x256xf32>, vector<4x256xf32>, vector<4x256xf32>, vector<4x256xf32>, vector<4x256xf32> -> vector<36x256xf32>
    %16 = arith.mulf %15, %0 : vector<36x256xf32>
    %cst = arith.constant dense<0.000000e+00> : vector<4x256xf32>
    %17 = tpu.matmul %1, %16, %cst {dimension_numbers = #tpu.dot_dimension_numbers<[1], [0], [0], [1], [0, 0, 1, 1], [], []>} : vector<4x36xf32>, vector<36x256xf32>, vector<4x256xf32> -> vector<4x256xf32>
    %18 = vector.broadcast %2 : vector<4x1xf32> to vector<4x256xf32>
    %19 = arith.addf %17, %18 : vector<4x256xf32>
    %cst_12 = arith.constant 0.000000e+00 : f32
    %20 = vector.broadcast %cst_12 : f32 to vector<4x256xf32>
    %21 = arith.maximumf %19, %20 : vector<4x256xf32>
    %c17_i32_13 = arith.constant 17 : i32
    %22 = tpu.dynamic_rotate %21 by %c17_i32_13 dim 1 : vector<4x256xf32>, i32 -> vector<4x256xf32>
    %c16_i32_14 = arith.constant 16 : i32
    %23 = tpu.dynamic_rotate %21 by %c16_i32_14 dim 1 : vector<4x256xf32>, i32 -> vector<4x256xf32>
    %c15_i32_15 = arith.constant 15 : i32
    %24 = tpu.dynamic_rotate %21 by %c15_i32_15 dim 1 : vector<4x256xf32>, i32 -> vector<4x256xf32>
    %c1_i32_16 = arith.constant 1 : i32
    %25 = tpu.dynamic_rotate %21 by %c1_i32_16 dim 1 : vector<4x256xf32>, i32 -> vector<4x256xf32>
    %c255_i32_17 = arith.constant 255 : i32
    %26 = tpu.dynamic_rotate %21 by %c255_i32_17 dim 1 : vector<4x256xf32>, i32 -> vector<4x256xf32>
    %c241_i32_18 = arith.constant 241 : i32
    %27 = tpu.dynamic_rotate %21 by %c241_i32_18 dim 1 : vector<4x256xf32>, i32 -> vector<4x256xf32>
    %c240_i32_19 = arith.constant 240 : i32
    %28 = tpu.dynamic_rotate %21 by %c240_i32_19 dim 1 : vector<4x256xf32>, i32 -> vector<4x256xf32>
    %c239_i32_20 = arith.constant 239 : i32
    %29 = tpu.dynamic_rotate %21 by %c239_i32_20 dim 1 : vector<4x256xf32>, i32 -> vector<4x256xf32>
    %30 = tpu.concatenate %22, %23, %24, %25, %21, %26, %27, %28, %29 in 0 : vector<4x256xf32>, vector<4x256xf32>, vector<4x256xf32>, vector<4x256xf32>, vector<4x256xf32>, vector<4x256xf32>, vector<4x256xf32>, vector<4x256xf32>, vector<4x256xf32> -> vector<36x256xf32>
    %31 = arith.mulf %30, %0 : vector<36x256xf32>
    %cst_21 = arith.constant dense<0.000000e+00> : vector<4x256xf32>
    %32 = tpu.matmul %3, %31, %cst_21 {dimension_numbers = #tpu.dot_dimension_numbers<[1], [0], [0], [1], [0, 0, 1, 1], [], []>} : vector<4x36xf32>, vector<36x256xf32>, vector<4x256xf32> -> vector<4x256xf32>
    %33 = vector.broadcast %4 : vector<4x1xf32> to vector<4x256xf32>
    %34 = arith.addf %32, %33 : vector<4x256xf32>
    %35 = arith.addf %34, %6 : vector<4x256xf32>
    %cst_22 = arith.constant 0.000000e+00 : f32
    %36 = vector.broadcast %cst_22 : f32 to vector<4x256xf32>
    %37 = arith.maximumf %35, %36 : vector<4x256xf32>
    %c0_23 = arith.constant 0 : index
    %c0_24 = arith.constant 0 : index
    %c0_25 = arith.constant 0 : index
    %38 = vector.load %arg7[%c0_23, %c0_24, %c0_25] : memref<1x4x256xf32, #tpu.memory_space<vmem>>, vector<1x4x256xf32>
    %39 = vector.shape_cast %38 : vector<1x4x256xf32> to vector<4x256xf32>
    %40 = vector.shape_cast %37 : vector<4x256xf32> to vector<1x4x256xf32>
    tpu.vector_store %arg7[%c0_23, %c0_24, %c0_25], %40 {strides = array<i32>} : memref<1x4x256xf32, #tpu.memory_space<vmem>>, vector<1x4x256xf32>,
    return
  }
  func.func @transform_0(%arg0: i32) -> (i32, i32, i32) {
    %c0_i32 = arith.constant 0 : i32
    %c0_i32_0 = arith.constant 0 : i32
    %c0_i32_1 = arith.constant 0 : i32
    return %arg0, %c0_i32, %c0_i32_0 : i32, i32, i32
  }
  func.func @transform_1(%arg0: i32) -> (i32, i32) {
    %c0_i32 = arith.constant 0 : i32
    %c0_i32_0 = arith.constant 0 : i32
    %c0_i32_1 = arith.constant 0 : i32
    return %c0_i32, %c0_i32_0 : i32, i32
  }
  func.func @transform_2(%arg0: i32) -> (i32, i32) {
    %c0_i32 = arith.constant 0 : i32
    %c0_i32_0 = arith.constant 0 : i32
    %c0_i32_1 = arith.constant 0 : i32
    return %c0_i32, %c0_i32_0 : i32, i32
  }
  func.func @transform_3(%arg0: i32) -> (i32, i32) {
    %c0_i32 = arith.constant 0 : i32
    %c0_i32_0 = arith.constant 0 : i32
    %c0_i32_1 = arith.constant 0 : i32
    return %c0_i32, %c0_i32_0 : i32, i32
  }
  func.func @transform_4(%arg0: i32) -> (i32, i32) {
    %c0_i32 = arith.constant 0 : i32
    %c0_i32_0 = arith.constant 0 : i32
    %c0_i32_1 = arith.constant 0 : i32
    return %c0_i32, %c0_i32_0 : i32, i32
  }
  func.func @transform_5(%arg0: i32) -> (i32, i32) {
    %c0_i32 = arith.constant 0 : i32
    %c0_i32_0 = arith.constant 0 : i32
    %c0_i32_1 = arith.constant 0 : i32
    return %c0_i32, %c0_i32_0 : i32, i32
  }
  func.func @transform_6(%arg0: i32) -> (i32, i32, i32) {
    %c0_i32 = arith.constant 0 : i32
    %c0_i32_0 = arith.constant 0 : i32
    %c0_i32_1 = arith.constant 0 : i32
    return %arg0, %c0_i32, %c0_i32_0 : i32, i32, i32
  }
}

</mosaic_0001>

<bundles_post_ra>
// kernel: tpu_custom_call.1
= control target key start
LH: loop header
LB: loop body
LE: loop exit
PB: predicated region body
PF: predicated region fallthrough
CT: control target
= control target key end

     0   :  { %s1402_s0 = inlined_call_operand.hbm [shape: f32[2,4,256], index: 0, kind: input, shape index: {}]   ;;  %s1403_s1 = inlined_call_operand.hbm [shape: f32[36,256], index: 1, kind: input, shape index: {}]   ;;  %s1404_s2 = inlined_call_operand.vmem [shape: f32[4,36], index: 2, kind: input, shape index: {}]   ;;  %s1405_s3 = inlined_call_operand.vmem [shape: f32[4,1], index: 3, kind: input, shape index: {}]   ;;  %s1406_s4 = inlined_call_operand.vmem [shape: f32[4,36], index: 4, kind: input, shape index: {}]   ;;  %s1407_s5 = inlined_call_operand.vmem [shape: f32[4,1], index: 5, kind: input, shape index: {}]   ;;  %s1408_s6 = inlined_call_operand.hbm [shape: f32[2,4,256], index: 6, kind: output, shape index: {}]  }
   0x1   :  { %1413 = sst [smem:[#allocation11_spill]] %s1403_s1 }
   0x2   :  { %11 = vsyncpa [#allocation3], 0 }
   0x3   :  { %13 = vsyncpa [#allocation3 + $0x1], 0 }
   0x4   :  { %14 = vsyncpa [#allocation6], 0 }
   0x5   :  { %15 = vsyncpa [#allocation4], 0 }
   0x6   :  { %17 = vsyncpa [#allocation4 + $0x1], 0  ;;  %s1038_s21 = smov 0   ;;  %s1040_s22 = smov 0  }
   0x7   :  { %s1042_s23 = smov 0   ;;  %s1044_s24 = smov 0  }
   0x8 LB: > { %s1059_s25 = sadd.s32 4294967295, %s986_s24   ;;  %s769_s26 = sadd.s32 4294967294, %s986_s24   ;;  %s986_s24 = sphi %s1044_s24, %s1432_s24   ;;  %s982_s23 = sphi %s1042_s23, %s1431_s23   ;;  %s978_s22 = sphi %s1040_s22, %s1430_s22   ;;  %s974_s21 = sphi %s1038_s21, %s1429_s21  }
   0x9   : > { %p43_p0 = scmp.ne.s32.totalorder %s978_s22, %s974_s21  ;;  %p1409_p1 = scmp.eq.s32.totalorder %s1059_s25, 0 }
   0xa   : > { %p178_p3 = scmp.eq.s32.totalorder %s769_s26, 1  ;;  %p770_p5 = scmp.ge.s32.totalorder %s986_s24, 1 }
   0xb   : > { %p1068_p4 = por %p1409_p1, %p43_p0  ;;  %p185_p7 = scmp.lt.s32.totalorder %s986_s24, 3 }
   0xc   : > { %p1073_p6 = por %p178_p3, %p43_p0  ;;  %s988_s30 = smov [#allocation5]  }
   0xd   : > { %s1414_s27 = scalar_select %p1068_p4, 1, 0 }
   0xe   : > { %s1415_s28 = scalar_select %p1073_p6, 1, 0 }
   0xf   : > { %p1078_p8 = pnand %p770_p5, %p185_p7  ;;  %s197_s7 = sshll.u32 %s988_s30, 4  ;;  %s198_s7 = int_to_ptr.vmem [resolvable:$true] %s197_s7 }
  0x10   : > { %s1092_s9 = sadd.s32 1, %s986_s24   ;;  %s30_s10 = sadd.s32 1, %s982_s23 }
  0x11   : > { %s1416_s29 = scalar_select %p1078_p8, 1, 0 }
  0x12   : > { %p801_p9 = pneg %p1078_p8  ;;  %s27_s11 = ssub.s32 %s986_s24, %s1092_s9 }
  0x13   : > { %s875_s12 = scalar_lea.vmem %s198_s7, 1280  ;;  %p883_p5 = scmp.lt.s32.totalorder %s198_s7, %s198_s7 }
  0x14   : > { %p1087_p11 = pnand %p801_p9, %p1409_p1  ;;  %p876_p13 = scmp.ne.s32.totalorder %s198_s7, %s875_s12 }
  0x15   : > { %p884_p7 = scmp.lt.s32.totalorder %s875_s12, %s875_s12 }
  0x16   : > { %p866_p12 = pneg %p1087_p11 }
  0x17   : > { %p885_p10 = por %p884_p7, %p883_p5 }
  0x18   : > { %p878_p0 = pnand %p876_p13, %p866_p12 }
  0x1a   : > { %p879_p3 = pneg %p878_p0 }
  0x1c   : > { %p886_p2 = pnand %p885_p10, %p879_p3 }
  0x1e   : > { %889 = shalt.err (!%p886_p2)
}
  0x1f   : > { %s989_s13 = smov 256   ;;  %s990_s14 = smov 16  }
  0x20   : > { %s1418_s1 = sld [smem:[#allocation11_spill]]  ;;  %p28_p9 = scmp.eq.s32.totalorder %s27_s11, 0 }
  0x21   : > { %p37_p12 = scmp.ne.s32.totalorder %s982_s23, %s978_s22  ;;  %p38_p10 = scmp.eq.s32.totalorder %s986_s24, 0 }
  0x22   : > { %p814_p2 = scmp.lt.s32.totalorder %s986_s24, 2  ;;  %p1419_p0 = scmp.eq.s32.totalorder %s1059_s25, 1 }
  0x23   : > { %s1109_s17 = scalar_select %p28_p9, %s982_s23, %s30_s10  }
  0x24   : > { %p39_p13 = por %p38_p10, %p37_p12  ;;  %p1113_p3 = por %p1419_p0, %p37_p12 }
  0x25   : > { %s223_s19 = sand.u32 1, %s982_s23   ;;  %s791_s20 = sshll.u32 %s986_s24, 7 }
  0x26   : > { %804 = dma.hbm_to_vmem [thread:$0]  (!%p1087_p11), %s1418_s1, 1280, %s198_s7, [#allocation6], %s989_s13, %s989_s13, %s990_s14  }
  0x27   : > { %s1420_s18 = scalar_select %p1113_p3, 1, 0 }
  0x28   : > { %s773_s26 = sshll.u32 %s223_s19, 3  ;;  %s1122_s12 = scalar_lea.hbm %s1402_s0, %s791_s20 }
  0x29   : > { %s227_s7 = scalar_lea.vmem [#allocation2], %s773_s26  ;;  %p1124_p11 = pnand %p814_p2, %p39_p13 }
  0x2a   : > { %s235_s10 = sshll.u32 %s227_s7, 4  ;;  %s224_s13 = scalar_lea.sflag [#allocation3], %s223_s19  ;;  %s236_s10 = int_to_ptr.vmem [resolvable:$true] %s235_s10 }
  0x2b   : > { %s890_s14 = scalar_lea.hbm %s1122_s12, 128  ;;  %p892_p7 = pneg %p1124_p11 }
  0x2c   : > { %p891_p5 = scmp.ne.s32.totalorder %s1122_s12, %s890_s14  ;;  %s895_s20 = scalar_lea.hbm %s1402_s0, 256 }
  0x2d   : > { %p896_p10 = scmp.lt.s32.totalorder %s1122_s12, %s1402_s0  ;;  %p897_p2 = scmp.lt.s32.totalorder %s895_s20, %s890_s14 }
  0x2e   : > { %p893_p9 = pnand %p892_p7, %p891_p5 }
  0x2f   : > { %p898_p13 = por %p897_p2, %p896_p10 }
  0x30   : > { %p894_p12 = pneg %p893_p9 }
  0x32   : > { %p899_p0 = pnand %p898_p13, %p894_p12 }
  0x34   : > { %902 = shalt.err (!%p899_p0)
}
  0x35   : > { %s903_s8 = scalar_lea.vmem %s236_s10, 128  ;;  %s991_s19 = smov [#allocation2]  }
  0x36   : > { %p904_p1 = scmp.ne.s32.totalorder %s236_s10, %s903_s8  ;;  %s908_s7 = sshll.u32 %s991_s19, 4  ;;  %s909_s7 = int_to_ptr.vmem [resolvable:$false] %s908_s7 }
  0x37   : > { %s910_s1 = scalar_lea.vmem %s909_s7, 256  ;;  %p911_p5 = scmp.lt.s32.totalorder %s236_s10, %s909_s7 }
  0x38   : > { %p906_p6 = pnand %p904_p1, %p892_p7  ;;  %p912_p9 = scmp.lt.s32.totalorder %s910_s1, %s903_s8 }
  0x3a   : > { %p907_p3 = pneg %p906_p6  ;;  %p913_p4 = por %p912_p9, %p911_p5 }
  0x3c   : > { %p914_p8 = pnand %p913_p4, %p907_p3 }
  0x3e   : > { %917 = shalt.err (!%p914_p8)
}
  0x3f   : > { %808 = dma.hbm_to_vmem [thread:$0]  (!%p1124_p11), %s1122_s12, 128, %s236_s10, %s224_s13  }
  0x40   : > { %p1422_p12 = scmp.ne.s32.totalorder %s1416_s29, 0 }
  0x41   : > { %s1145_s14 = sand.u32 (!%p1422_p12), 1, %s978_s22   ;;  %p1423_p1 = scmp.ne.s32.totalorder (!%p1422_p12), %s1414_s27, 0 }
  0x42   : > { %244 = sbr.rel (%p1422_p12) target bundleno = 791 (0x317), region = 44  ;;  %s777_s15 = sshll.u32 (!%p1422_p12), %s1145_s14, 3 }
  0x43   : > { %s247_s16 = scalar_lea.sflag (!%p1422_p12), [#allocation3], %s1145_s14  ;;  %s250_s1 = scalar_lea.vmem (!%p1422_p12), [#allocation2], %s777_s15 }
  0x47   : > { %961 = dma.done.wait (%p1423_p1), %s247_s16, 128  }
  0x48   : > { %963 = vsyncadd (%p1423_p1), %s247_s16, 4294967168  ;;  %p1424_p4 = scmp.eq.s32.totalorder %s1059_s25, 0 }
  0x4a   : > { %965 = dma.done.wait (%p1424_p4), [#allocation6], 1280   ;;  %p1425_p6 = pmov %p1424_p4 }
  0x4b   : > { %v1159_v0 = vld [vmem:[%s250_s1] sm:$0xff]  ;;  %s992_s29 = smov 111   ;;  %s993_s12 = smov 112   ;;  %v998_v2 = vmov 0.0   ;;  %v999_v3 = vmov 0   ;;  %v305_v5 = vlaneseq  ;;  %vm383_vm1 = vcmask 1043456  }
  0x4c   : > { %967 = vsyncadd (%p1425_p6), [#allocation6], 4294966016  ;;  %352 = vrot.lane.b32.xlu1 %v1159_v0, %s992_s29  ;;  %345 = vrot.lane.b32.xlu0 %v1159_v0, %s993_s12  ;;  %v1167_v1 = vcombine.high %v1159_v0, %v1159_v0  ;;  %s994_s27 = smov 127   ;;  %s995_s10 = smov 113   ;;  %v294_v4 = vld [vmem:[%s1405_s3] sm:$0xf] }
  0x4d   : > { %s996_s11 = smov 1   ;;  %s997_s13 = smov 16   ;;  %481 = vmatprep.mubr.f32.mxu0 %v998_v2  ;;  %658 = vmatprep.mubr.f32.mxu1 %v998_v2  ;;  %v1200_v6 = vand.u32 127, %v305_v5  ;;  %v1203_v9 = vld [vmem:[#allocation5 + $0x40] sm:$0xf]  ;;  %v1226_v29 = vld [vmem:[#allocation5 + $0x38] sm:$0xff] }
  0x4e   : > { %862 = vset.pattern.permute.xlu0 %v999_v3  ;;  %s1000_s20 = smov 15   ;;  %s1001_s30 = smov 17   ;;  %v1205_v10 = vld [vmem:[#allocation5 + $0x48] sm:$0xf]  ;;  %v1228_v30 = vld [vmem:[#allocation5 + $0x30] sm:$0xff]  ;;  %v1242_v39 = vld [vmem:[#allocation5 + $0x20] sm:$0xff] }
  0x4f   : > { %vm356_vm0 = vcmp.lt.s32.totalorder %v1200_v6, 111  ;;  %vm335_vm2 = vcmp.lt.s32.totalorder %v1200_v6, 127  ;;  %vm349_vm3 = vcmp.lt.s32.totalorder %v1200_v6, 112  ;;  %vm342_vm4 = vcmp.lt.s32.totalorder %v1200_v6, 113  ;;  %v1236_v35 = vld [vmem:[#allocation5 + $0x28] sm:$0xff]  ;;  %v1255_v53 = vld [vmem:[#allocation5 + $0x18] sm:$0xff] }
  0x50   : > { %331 = vrot.lane.b32.xlu0 %v1159_v0, %s994_s27  ;;  %354 = vrot.lane.b32.xlu1 %v1167_v1, %s992_s29  ;;  %vm328_vm5 = vcmp.lt.s32.totalorder %v1200_v6, 1  ;;  %vm314_vm6 = vcmp.lt.s32.totalorder %v1200_v6, 16  ;;  %vm321_vm7 = vcmp.lt.s32.totalorder %v1200_v6, 15  ;;  %v1257_v54 = vld [vmem:[#allocation5 + $0x10] sm:$0xff]  ;;  %vm307_vm8 = vcmp.lt.s32.totalorder %v1200_v6, 17  ;;  %v1272_v5 = vld [vmem:[#allocation5 + $0x8] sm:$0xff] }
  0x51   : > { %vm407_vm9 = vcmask 293888   ;;  %s675_s26 = scalar_lea.sflag [#allocation4], %s1145_s14  ;;  %p1426_p3 = scmp.ne.s32.totalorder %s1420_s18, 0 }
  0x52   : > { %s1002_s19 = smov [#allocation7]  }
  0x54   : > { %333 = vrot.lane.b32.xlu1 %v1167_v1, %s994_s27  ;;  %347 = vrot.lane.b32.xlu0 %v1167_v1, %s993_s12 }
  0x58   : > { %340 = vrot.lane.b32.xlu1 %v1167_v1, %s995_s10  ;;  %338 = vrot.lane.b32.xlu0 %v1159_v0, %s995_s10 }
  0x5c   : > { %326 = vrot.lane.b32.xlu1 %v1167_v1, %s996_s11  ;;  %324 = vrot.lane.b32.xlu0 %v1159_v0, %s996_s11 }
  0x60   : > { %312 = vrot.lane.b32.xlu1 %v1167_v1, %s997_s13  ;;  %310 = vrot.lane.b32.xlu0 %v1159_v0, %s997_s13 }
  0x64   : > { %319 = vrot.lane.b32.xlu1 %v1167_v1, %s1000_s20  ;;  %317 = vrot.lane.b32.xlu0 %v1159_v0, %s1000_s20 }
  0x68   : > { %303 = vrot.lane.b32.xlu1 %v1167_v1, %s1001_s30  ;;  %301 = vrot.lane.b32.xlu0 %v1159_v0, %s1001_s30 }
  0x6c   : > { %404 = vperm.xlu0 %862, %v294_v4  }
  0xbe   : > { %v353_v7 = vpop.permute.xlu1 %352  ;;  %v346_v8 = vpop.permute.xlu0 %345 }
  0xc2   : > { %v332_v11 = vpop.permute.xlu0 %331  ;;  %v355_v12 = vpop.permute.xlu1 %354 }
  0xc3   : > { %v357_v13 = vsel %vm356_vm0, %v353_v7, %v355_v12  ;;  %v358_v14 = vsel %vm356_vm0, %v355_v12, %v353_v7  ;;  %v1274_v7 = vld [vmem:[#allocation5] sm:$0xff] }
  0xc4   : > { %v400_v15 = vmul.f32 %v357_v13, %v1203_v9  ;;  %v401_v16 = vmul.f32 %v358_v14, %v1205_v10 }
  0xc6   : > { %v334_v17 = vpop.permute.xlu1 %333  ;;  %v348_v18 = vpop.permute.xlu0 %347  ;;  %780 = vmatprep.subr.msk.mxu0 %vm383_vm1, %v401_v16  ;;  %v293_v16 = vld [vmem:[%s1404_s2] sm:$0xf] }
  0xc7   : > { %v336_v19 = vsel %vm335_vm2, %v332_v11, %v334_v17  ;;  %v337_v20 = vsel %vm335_vm2, %v334_v17, %v332_v11  ;;  %v350_v21 = vsel %vm349_vm3, %v346_v8, %v348_v18  ;;  %v351_v22 = vsel %vm349_vm3, %v348_v18, %v346_v8  ;;  %781 = vmatpush1.msk.msra.mxu0 %vm383_vm1, %v400_v15 }
  0xc8   : > { %v374_v23 = vrot.slane %v337_v20, 4  ;;  %v373_v24 = vrot.slane %v336_v19, 4  ;;  %v379_v25 = vrot.slane %v350_v21, 4  ;;  %v380_v26 = vrot.slane %v351_v22, 4 }
  0xca   : > { %v341_v27 = vpop.permute.xlu1 %340  ;;  %v339_v28 = vpop.permute.xlu0 %338  ;;  %v389_v36 = vsel %vm383_vm1, %v1167_v1, %v374_v23  ;;  %v388_v40 = vsel %vm383_vm1, %v1159_v0, %v373_v24  ;;  %v296_v24 = vld [vmem:[%s1407_s5] sm:$0xf] }
  0xcb   : > { %v343_v31 = vsel %vm342_vm4, %v339_v28, %v341_v27  ;;  %v344_v32 = vsel %vm342_vm4, %v341_v27, %v339_v28  ;;  %v397_v43 = vmul.f32 %v389_v36, %v1236_v35  ;;  %v396_v44 = vmul.f32 %v388_v40, %v1242_v39 }
  0xcc   : > { %v390_v33 = vsel %vm383_vm1, %v343_v31, %v379_v25  ;;  %v391_v34 = vsel %vm383_vm1, %v344_v32, %v380_v26 }
  0xcd   : > { %v399_v37 = vmul.f32 %v391_v34, %v1226_v29  ;;  %v398_v38 = vmul.f32 %v390_v33, %v1228_v30 }
  0xce   : > { %v327_v41 = vpop.permute.xlu1 %326  ;;  %v325_v42 = vpop.permute.xlu0 %324 }
  0xcf   : > { %441 = vmatprep.subr.mxu0 %v399_v37  ;;  %v329_v47 = vsel %vm328_vm5, %v325_v42, %v327_v41  ;;  %v330_v48 = vsel %vm328_vm5, %v327_v41, %v325_v42 }
  0xd0   : > { %442 = vmatpush1.msra.mxu0 %v398_v38  ;;  %v367_v49 = vrot.slane %v330_v48, 4  ;;  %v368_v50 = vrot.slane %v329_v47, 4 }
  0xd1   : > { %443 = vmatprep.subr.mxu0 %v397_v43 }
  0xd2   : > { %v313_v45 = vpop.permute.xlu1 %312  ;;  %v311_v46 = vpop.permute.xlu0 %310  ;;  %444 = vmatpush1.msra.mxu0 %v396_v44 }
  0xd3   : > { %v315_v55 = vsel %vm314_vm6, %v311_v46, %v313_v45  ;;  %v316_v56 = vsel %vm314_vm6, %v313_v45, %v311_v46 }
  0xd4   : > { %v361_v63 = vrot.slane %v316_v56, 4  ;;  %v362_v2 = vrot.slane %v315_v55, 4 }
  0xd6   : > { %v320_v51 = vpop.permute.xlu1 %319  ;;  %v318_v52 = vpop.permute.xlu0 %317 }
  0xd7   : > { %v322_v57 = vsel %vm321_vm7, %v318_v52, %v320_v51  ;;  %v323_v58 = vsel %vm321_vm7, %v320_v51, %v318_v52 }
  0xd8   : > { %v386_v59 = vsel %vm383_vm1, %v323_v58, %v367_v49  ;;  %v387_v60 = vsel %vm383_vm1, %v322_v57, %v368_v50 }
  0xd9   : > { %v395_v61 = vmul.f32 %v387_v60, %v1255_v53  ;;  %v394_v62 = vmul.f32 %v386_v59, %v1257_v54 }
  0xda   : > { %v304_v3 = vpop.permute.xlu1 %303  ;;  %v302_v4 = vpop.permute.xlu0 %301 }
  0xdb   : > { %v308_v8 = vsel %vm307_vm8, %v302_v4, %v304_v3  ;;  %v309_v11 = vsel %vm307_vm8, %v304_v3, %v302_v4  ;;  %445 = vmatprep.subr.mxu0 %v395_v61 }
  0xdc   : > { %v384_v12 = vsel %vm383_vm1, %v309_v11, %v361_v63  ;;  %v385_v13 = vsel %vm383_vm1, %v308_v8, %v362_v2  ;;  %446 = vmatpush1.msra.mxu0 %v394_v62 }
  0xdd   : > { %v393_v14 = vmul.f32 %v385_v13, %v1272_v5  ;;  %v392_v15 = vmul.f32 %v384_v12, %v1274_v7 }
  0xdf   : > { %447 = vmatprep.subr.mxu0 %v393_v14 }
  0xe0   : > { %448 = vmatpush1.msra.mxu0 %v392_v15 }
  0xe1   : > { %782 = vmatmul.mubr.msk.f32.vlgmr.msra.gmra.mxu0 %vm407_vm9, %v293_v16 }
  0xe7   : > { %v405_v17 = vpop.permute.xlu0 %404 }
 0x1a1   : > { %v483_v18 = vpop.f32.mrf.mxu0 }
 0x1a2   : > { %v484_v19 = vadd.f32 %v483_v18, %v405_v17 }
 0x1a3   : > { %v485_v20 = vpop.f32.mrf.mxu0 }
 0x1a4   : > { %v488_v21 = vmax.f32 %v484_v19, 0.0  ;;  %v486_v22 = vadd.f32 %v485_v20, %v405_v17 }
 0x1a6   : > { %532 = vrot.lane.b32.xlu0 %v488_v21, %s992_s29  ;;  %526 = vrot.lane.b32.xlu1 %v488_v21, %s993_s12  ;;  %v489_v23 = vmax.f32 %v486_v22, 0.0 }
 0x1aa   : > { %514 = vrot.lane.b32.xlu0 %v488_v21, %s994_s27  ;;  %528 = vrot.lane.b32.xlu1 %v489_v23, %s993_s12 }
 0x1ae   : > { %520 = vrot.lane.b32.xlu0 %v488_v21, %s995_s10  ;;  %534 = vrot.lane.b32.xlu1 %v489_v23, %s992_s29 }
 0x1b2   : > { %508 = vrot.lane.b32.xlu0 %v488_v21, %s996_s11  ;;  %516 = vrot.lane.b32.xlu1 %v489_v23, %s994_s27  ;;  %s792_s27 = sshll.u32 %s1059_s25, 7  ;;  %s922_s25 = sshll.u32 %s1002_s19, 4  ;;  %s923_s25 = int_to_ptr.vmem [resolvable:$false] %s922_s25 }
 0x1b6   : > { %496 = vrot.lane.b32.xlu0 %v488_v21, %s997_s13  ;;  %522 = vrot.lane.b32.xlu1 %v489_v23, %s995_s10  ;;  %s282_s10 = scalar_lea.vmem [#allocation7], %s777_s15  ;;  %s924_s15 = scalar_lea.vmem %s923_s25, 256 }
 0x1ba   : > { %502 = vrot.lane.b32.xlu0 %v488_v21, %s1000_s20  ;;  %510 = vrot.lane.b32.xlu1 %v489_v23, %s996_s11  ;;  %s689_s11 = sshll.u32 %s282_s10, 4  ;;  %s690_s11 = int_to_ptr.vmem [resolvable:$true] %s689_s11 }
 0x1bb   : > { %s918_s8 = scalar_lea.vmem %s690_s11, 128  ;;  %p925_p10 = scmp.lt.s32.totalorder %s690_s11, %s923_s25 }
 0x1bc   : > { %p919_p8 = scmp.ne.s32.totalorder %s690_s11, %s918_s8  ;;  %p926_p2 = scmp.lt.s32.totalorder %s924_s15, %s918_s8 }
 0x1be   : > { %490 = vrot.lane.b32.xlu0 %v488_v21, %s1001_s30  ;;  %498 = vrot.lane.b32.xlu1 %v489_v23, %s997_s13  ;;  %p920_p11 = pnand %p919_p8, %p1426_p3  ;;  %p927_p13 = por %p926_p2, %p925_p10 }
 0x1c0   : > { %p921_p7 = pneg %p920_p11 }
 0x1c2   : > { %582 = vperm.xlu0 %862, %v296_v24   ;;  %504 = vrot.lane.b32.xlu1 %v489_v23, %s1000_s20  ;;  %v295_v24 = vld [vmem:[%s1406_s4] sm:$0xf]  ;;  %p928_p0 = pnand %p927_p13, %p921_p7 }
 0x1c6   : > { %492 = vrot.lane.b32.xlu1 %v489_v23, %s1001_s30  ;;  %s687_s30 = scalar_lea.hbm %s1408_s6, %s792_s27 }
 0x218   : > { %v533_v25 = vpop.permute.xlu0 %532  ;;  %v527_v26 = vpop.permute.xlu1 %526 }
 0x21c   : > { %v515_v27 = vpop.permute.xlu0 %514  ;;  %v529_v28 = vpop.permute.xlu1 %528 }
 0x21d   : > { %v530_v40 = vsel %vm349_vm3, %v527_v26, %v529_v28  ;;  %v531_v41 = vsel %vm349_vm3, %v529_v28, %v527_v26 }
 0x21e   : > { %v558_v45 = vrot.slane %v530_v40, 4  ;;  %v559_v46 = vrot.slane %v531_v41, 4 }
 0x220   : > { %v521_v31 = vpop.permute.xlu0 %520  ;;  %v535_v32 = vpop.permute.xlu1 %534 }
 0x221   : > { %v536_v33 = vsel %vm356_vm0, %v533_v25, %v535_v32  ;;  %v537_v34 = vsel %vm356_vm0, %v535_v32, %v533_v25 }
 0x222   : > { %v578_v36 = vmul.f32 %v536_v33, %v1203_v9  ;;  %v579_v37 = vmul.f32 %v537_v34, %v1205_v10 }
 0x224   : > { %783 = vmatprep.subr.msk.mxu1 %vm383_vm1, %v579_v37  ;;  %v517_v38 = vpop.permute.xlu1 %516  ;;  %v509_v9 = vpop.permute.xlu0 %508 }
 0x225   : > { %v518_v42 = vsel %vm335_vm2, %v515_v27, %v517_v38  ;;  %v519_v43 = vsel %vm335_vm2, %v517_v38, %v515_v27  ;;  %784 = vmatpush1.msk.msra.mxu1 %vm383_vm1, %v578_v36 }
 0x226   : > { %v553_v44 = vrot.slane %v519_v43, 4  ;;  %v552_v10 = vrot.slane %v518_v42, 4 }
 0x228   : > { %v523_v47 = vpop.permute.xlu1 %522  ;;  %v567_v52 = vsel %vm383_vm1, %v489_v23, %v553_v44  ;;  %v566_v57 = vsel %vm383_vm1, %v488_v21, %v552_v10  ;;  %v497_v58 = vpop.permute.xlu0 %496 }
 0x229   : > { %v524_v48 = vsel %vm342_vm4, %v521_v31, %v523_v47  ;;  %v525_v49 = vsel %vm342_vm4, %v523_v47, %v521_v31  ;;  %v575_v60 = vmul.f32 %v567_v52, %v1236_v35  ;;  %v574_v61 = vmul.f32 %v566_v57, %v1242_v39 }
 0x22a   : > { %v568_v50 = vsel %vm383_vm1, %v524_v48, %v558_v45  ;;  %v569_v51 = vsel %vm383_vm1, %v525_v49, %v559_v46 }
 0x22b   : > { %v577_v55 = vmul.f32 %v569_v51, %v1226_v29  ;;  %v576_v56 = vmul.f32 %v568_v50, %v1228_v30 }
 0x22c   : > { %v511_v59 = vpop.permute.xlu1 %510  ;;  %v503_v30 = vpop.permute.xlu0 %502 }
 0x22d   : > { %618 = vmatprep.subr.mxu1 %v577_v55  ;;  %v512_v63 = vsel %vm328_vm5, %v509_v9, %v511_v59  ;;  %v513_v29 = vsel %vm328_vm5, %v511_v59, %v509_v9 }
 0x22e   : > { %619 = vmatpush1.msra.mxu1 %v576_v56  ;;  %v546_v2 = vrot.slane %v513_v29, 4  ;;  %v547_v3 = vrot.slane %v512_v63, 4 }
 0x22f   : > { %620 = vmatprep.subr.mxu1 %v575_v60 }
 0x230   : > { %621 = vmatpush1.msra.mxu1 %v574_v61  ;;  %v499_v62 = vpop.permute.xlu1 %498  ;;  %v491_v16 = vpop.permute.xlu0 %490 }
 0x231   : > { %v500_v8 = vsel %vm314_vm6, %v497_v58, %v499_v62  ;;  %v501_v35 = vsel %vm314_vm6, %v499_v62, %v497_v58 }
 0x232   : > { %v540_v17 = vrot.slane %v501_v35, 4  ;;  %v541_v18 = vrot.slane %v500_v8, 4 }
 0x234   : > { %v505_v4 = vpop.permute.xlu1 %504 }
 0x235   : > { %v506_v39 = vsel %vm321_vm7, %v503_v30, %v505_v4  ;;  %v507_v11 = vsel %vm321_vm7, %v505_v4, %v503_v30 }
 0x236   : > { %v564_v12 = vsel %vm383_vm1, %v507_v11, %v546_v2  ;;  %v565_v13 = vsel %vm383_vm1, %v506_v39, %v547_v3 }
 0x237   : > { %v573_v14 = vmul.f32 %v565_v13, %v1255_v53  ;;  %v572_v15 = vmul.f32 %v564_v12, %v1257_v54 }
 0x238   : > { %v493_v19 = vpop.permute.xlu1 %492 }
 0x239   : > { %v494_v20 = vsel %vm307_vm8, %v491_v16, %v493_v19  ;;  %v495_v21 = vsel %vm307_vm8, %v493_v19, %v491_v16  ;;  %622 = vmatprep.subr.mxu1 %v573_v14 }
 0x23a   : > { %v562_v22 = vsel %vm383_vm1, %v495_v21, %v540_v17  ;;  %v563_v23 = vsel %vm383_vm1, %v494_v20, %v541_v18  ;;  %623 = vmatpush1.msra.mxu1 %v572_v15 }
 0x23b   : > { %v571_v53 = vmul.f32 %v563_v23, %v1272_v5  ;;  %v570_v54 = vmul.f32 %v562_v22, %v1274_v7 }
 0x23d   : > { %624 = vmatprep.subr.mxu1 %v571_v53  ;;  %v583_v6 = vpop.permute.xlu0 %582 }
 0x23e   : > { %625 = vmatpush1.msra.mxu1 %v570_v54 }
 0x23f   : > { %785 = vmatmul.mubr.msk.f32.vlgmr.msra.gmra.mxu1 %vm407_vm9, %v295_v24 }
 0x2ff   : > { %v660_v25 = vpop.f32.mrf.mxu1 }
 0x300   : > { %v661_v26 = vadd.f32 %v660_v25, %v583_v6 }
 0x301   : > { %v662_v27 = vpop.f32.mrf.mxu1 }
 0x302   : > { %v665_v28 = vadd.f32 %v661_v26, %v1159_v0  ;;  %v663_v31 = vadd.f32 %v662_v27, %v583_v6 }
 0x304   : > { %v666_v5 = vadd.f32 %v663_v31, %v1167_v1  ;;  %v667_v7 = vmax.f32 %v665_v28, 0.0 }
 0x306   : > { %v668_v32 = vmax.f32 %v666_v5, 0.0 }
 0x308   : > { %v671_v33 = vcombine.low %v667_v7, %v668_v32 }
 0x30a   : > { %673 = vst [vmem:[%s282_s10] sm:$0xff] %v671_v33 }
 0x30b   : > { %931 = shalt.err (!%p928_p0)
}
 0x30c   : > { %s932_s7 = scalar_lea.hbm %s687_s30, 128  ;;  %s936_s1 = scalar_lea.hbm %s1408_s6, 256 }
 0x30d   : > { %p933_p5 = scmp.ne.s32.totalorder %s687_s30, %s932_s7  ;;  %p937_p1 = scmp.lt.s32.totalorder %s687_s30, %s1408_s6 }
 0x30e   : > { %p938_p4 = scmp.lt.s32.totalorder %s936_s1, %s932_s7 }
 0x30f   : > { %p934_p9 = pnand %p933_p5, %p1426_p3 }
 0x310   : > { %p939_p6 = por %p938_p4, %p937_p1 }
 0x311   : > { %p935_p12 = pneg %p934_p9 }
 0x313   : > { %p940_p8 = pnand %p939_p6, %p935_p12 }
 0x315   : > { %943 = shalt.err (!%p940_p8)
}
 0x316   : > { %799 = dma.vmem_to_hbm [thread:$0]  (%p1426_p3), %s690_s11, 128, %s687_s30, %s675_s26  }
 0x317 PF: > { %s701_s27 = sand.u32 1, %s974_s21   ;;  %p1427_p11 = scmp.ne.s32.totalorder %s1415_s28, 0 }
 0x318   : > { %p1428_p7 = scmp.ge.s32.totalorder %s986_s24, 2  ;;  %s702_s10 = scalar_lea.sflag [#allocation4], %s701_s27 }
 0x31a   : > { %p810_p10 = pnand %p1428_p7, %p1427_p11 }
 0x31c   : > { %p811_p2 = pneg %p810_p10 }
 0x31e   : > { %969 = dma.done.wait (%p811_p2), %s702_s10, 128  }
 0x31f   : > { %971 = vsyncadd (%p811_p2), %s702_s10, 4294967168  ;;  %p20_p13 = scmp.ge.s32.totalorder %s1092_s9, 4   ;;  %s1429_s21 = smov %s978_s22 }
 0x320   : > { %s1430_s22 = smov %s982_s23  ;;  %s1431_s23 = smov %s1109_s17 }
 0x321   : > { %s1432_s24 = smov %s1092_s9  ;;  %22 = sbr.rel (!%p20_p13) target bundleno = 8 (0x8), region = 93 }
 0x326   :  { %707 = vsyncpa [#allocation3], 1 }
 0x327   :  { %709 = vsyncpa [#allocation3 + $0x1], 1 }
 0x328   :  { %710 = vsyncpa [#allocation6], 1 }
 0x329   :  { %711 = vsyncpa [#allocation4], 1 }
 0x32a   :  { %713 = vsyncpa [#allocation4 + $0x1], 1 }

</bundles_post_ra>
